<compile_context>
chip_gen: v6e
topology: v6e:2x2x1
jax: 0.10.0
libtpu: 0.0.40
codegen_flags: <defaults>
</compile_context>

<pallas_src>
import functools
import math

import jax
import jax.numpy as jnp
from jax.experimental import pallas as pl
from jax.experimental.pallas import tpu as pltpu

# ----------------------------- configuration --------------------------------
B = 8        # batch
D = 32       # state (feature) dim
H = 32       # hidden dim of each value MLP
V_NUM = 4    # number of ensemble members (len(v_list))
QUANTILE = 0.5
LANES = 128  # lane width of the packed layer-2 output (lane-dense)
MATMUL_DTYPE = jnp.bfloat16   # MXU operand dtype (f32 accumulate)


def _round_up(x, m):
    return ((x + m - 1) // m) * m


# ------------------------------- kernel -------------------------------------
def _quantile_of_members(members, q):
    """members: list of V arrays of identical shape; across the list, every
    lane sees all V ensemble values (in some rotation)."""
    n = len(members)
    pos = q * (n - 1)
    lo_i = int(math.floor(pos))
    hi_i = int(math.ceil(pos))
    frac = float(pos - lo_i)

    if n == 4 and lo_i == 1 and hi_i == 2 and abs(frac - 0.5) < 1e-12:
        # median of 4 = (sum - min - max) / 2  -> 6 VPU ops, no full sort.
        total = (members[0] + members[1]) + (members[2] + members[3])
        mn = jnp.minimum(jnp.minimum(members[0], members[1]),
                         jnp.minimum(members[2], members[3]))
        mx = jnp.maximum(jnp.maximum(members[0], members[1]),
                         jnp.maximum(members[2], members[3]))
        return (total - mn - mx) * 0.5

    # General case: static compare-exchange network (V is a tiny constant).
    e = list(members)
    for i in range(n):
        for j in range(n - 1 - i):
            lo = jnp.minimum(e[j], e[j + 1])
            hi = jnp.maximum(e[j], e[j + 1])
            e[j], e[j + 1] = lo, hi
    return e[lo_i] * (1.0 - frac) + e[hi_i] * frac


def mm_v_kernel(x_ref, w1_ref, b1_ref, w2_ref, b2_ref, out_ref, *,
                v_num, quantile):
    """x_ref [TB,D] bf16; w1_ref [D,V*H] bf16; b1_ref [1,V*H] f32;
    w2_ref [V*H,LANES] bf16; b2_ref [1,LANES] f32;
    out_ref [TB,LANES] f32 (every lane holds the quantile)."""
    x = x_ref[...]                                                  # [TB, D]

    # Fused layer 1: one MXU pass over all ensemble members (N = V*H = 128).
    h = jnp.dot(x, w1_ref[...], preferred_element_type=jnp.float32)
    h = jnp.maximum(h + b1_ref[...], 0.0)                           # f32 VPU

    # Fused layer 2: lane-replicated block-diagonal weight -> lane c = v_{c%V}.
    vals = jnp.dot(h.astype(w2_ref.dtype), w2_ref[...],
                   preferred_element_type=jnp.float32)
    vals = vals + b2_ref[...]                                       # [TB, LANES]

    # XLU lane rolls bring every member's value into every lane (V | LANES).
    members = [vals] + [pltpu.roll(vals, shift=s, axis=1)
                        for s in range(1, v_num)]

    out_ref[...] = _quantile_of_members(members, quantile)          # lane-dense


# ----------------------------- weight packing --------------------------------
def pack_params(w1, b1, w2, b2, lanes=LANES, matmul_dtype=MATMUL_DTYPE):
    """Pack per-member weights into lane-dense fused layouts (call ONCE)."""
    V, Dd, Hh = w1.shape
    VH = V * Hh
    assert lanes % V == 0, "lane-roll quantile trick needs V | LANES"
    # TODO(synk): if V does not divide 128, fall back to per-lane slicing.

    w1_cat = jnp.transpose(w1, (1, 0, 2)).reshape(Dd, VH)           # [D, V*H]
    b1_cat = jnp.transpose(b1, (1, 0, 2)).reshape(1, VH)            # [1, V*H]

    member_of_lane = jnp.arange(lanes) % V                          # [LANES]
    row_member = jnp.arange(VH) // Hh                               # [V*H]
    row_unit = jnp.arange(VH) % Hh                                  # [V*H]
    w2_flat = w2[:, :, 0]                                           # [V, H]
    # w2_rep[r, c] = w2[c % V, r % H] if (r // H) == (c % V) else 0
    w2_rep = jnp.where(
        row_member[:, None] == member_of_lane[None, :],
        w2_flat[member_of_lane[None, :], row_unit[:, None]],
        0.0,
    )                                                               # [V*H, LANES]
    b2_rep = b2[:, 0, 0][member_of_lane][None, :]                   # [1, LANES]

    return (w1_cat.astype(matmul_dtype),      # MXU operand -> bf16
            b1_cat.astype(jnp.float32),       # VPU bias stays f32
            w2_rep.astype(matmul_dtype),
            b2_rep.astype(jnp.float32))


# ----------------------------- tiling heuristic ------------------------------
def _choose_tiling(batch):
    """One grid step up to 1024 rows; 1024-row tiles beyond that (so large
    batches get >= 2 'parallel' steps -> both v7x TensorCores)."""
    b16 = _round_up(batch, 16)           # 16 keeps bf16 sublane tiling happy
    if b16 <= 1024:
        return b16, b16                  # single step, no 8-row micro-tiles
    tile_b = 1024
    return tile_b, _round_up(b16, tile_b)


# ------------------------------- pallas launch --------------------------------
def _mm_v_pallas(state, w1_cat, b1_cat, w2_rep, b2_rep, *, v_num, quantile):
    Bb, Dd = state.shape
    VH = w1_cat.shape[1]
    tile_b, b_pad = _choose_tiling(Bb)

    x = state.astype(w1_cat.dtype)                       # bf16 matmul operand
    if b_pad != Bb:
        x = jnp.pad(x, ((0, b_pad - Bb), (0, 0)))

    kernel = functools.partial(mm_v_kernel, v_num=v_num, quantile=quantile)
    out = pl.pallas_call(
        kernel,
        out_shape=jax.ShapeDtypeStruct((b_pad, LANES), jnp.float32),
        grid_spec=pltpu.PrefetchScalarGridSpec(
            num_scalar_prefetch=0,
            grid=(b_pad // tile_b,),
            in_specs=[
                pl.BlockSpec((tile_b, Dd), lambda i: (i, 0)),   # state tile
                pl.BlockSpec((Dd, VH), lambda i: (0, 0)),       # resident weights
                pl.BlockSpec((1, VH), lambda i: (0, 0)),
                pl.BlockSpec((VH, LANES), lambda i: (0, 0)),
                pl.BlockSpec((1, LANES), lambda i: (0, 0)),
            ],
            out_specs=pl.BlockSpec((tile_b, LANES), lambda i: (i, 0)),
        ),
        compiler_params=pltpu.CompilerParams(
            dimension_semantics=("parallel",)),
    )(x, w1_cat, b1_cat, w2_rep, b2_rep)

    # All lanes carry the quantile; take lane 0 and drop batch padding -> [B].
    return out[:Bb, 0]


# ------------------------------- public API -----------------------------------
def make_mm_v(w1, b1, w2, b2, quantile=QUANTILE):
    """Pack weights ONCE (hoisted out of the per-call hot path) and return a
    jitted forward function state[B,D] -> quantile values [B]."""
    v_num = int(w1.shape[0])
    packed = pack_params(w1, b1, w2, b2)          # eager, runs exactly once

    @jax.jit
    def forward(state):
        return _mm_v_pallas(state, *packed, v_num=v_num, quantile=quantile)

    return forward


# ----------------------------- reference (pure JAX) --------------------------
def mm_v_reference(state, w1, b1, w2, b2, quantile=QUANTILE):
    V = w1.shape[0]
    preds = []
    for k in range(V):
        h = jnp.maximum(state @ w1[k] + b1[k], 0.0)
        preds.append((h @ w2[k] + b2[k])[:, 0])
    preds = jnp.stack(preds, axis=1)                 # [B, V]
    return jnp.quantile(preds, quantile, axis=1)     # matches torch.quantile


# --------------------------------- main --------------------------------------
if __name__ == "__main__":
    key = jax.random.PRNGKey(0)
    k_x, k_w1, k_b1, k_w2, k_b2 = jax.random.split(key, 5)

    state = jax.random.normal(k_x, (B, D), dtype=jnp.float32)
    w1 = jax.random.normal(k_w1, (V_NUM, D, H), dtype=jnp.float32) * 0.1
    b1 = jax.random.normal(k_b1, (V_NUM, 1, H), dtype=jnp.float32) * 0.1
    w2 = jax.random.normal(k_w2, (V_NUM, H, 1), dtype=jnp.float32) * 0.1
    b2 = jax.random.normal(k_b2, (V_NUM, 1, 1), dtype=jnp.float32) * 0.1

    mm_v = make_mm_v(w1, b1, w2, b2)      # weight packing happens once, here
    out = jax.block_until_ready(mm_v(state))
    ref = mm_v_reference(state, w1, b1, w2, b2)

    assert out.shape == (B,)
    # bf16 MXU operands with f32 accumulation vs. full-f32 reference:
    # expect ~1e-2 relative agreement.
    assert jnp.allclose(out, ref, atol=3e-2, rtol=3e-2), (out, ref)

    print("KERNEL_OK")
</pallas_src>

<mosaic_0001>
module attributes {stable_mosaic.version = 11 : i64} {
  func.func @mm_v_kernel(%arg0: i32, %arg1: memref<16x32xbf16, #tpu.memory_space<vmem>>, %arg2: memref<32x128xbf16, #tpu.memory_space<vmem>>, %arg3: memref<1x128xf32, #tpu.memory_space<vmem>>, %arg4: memref<128x128xbf16, #tpu.memory_space<vmem>>, %arg5: memref<1x128xf32, #tpu.memory_space<vmem>>, %arg6: memref<16x128xf32, #tpu.memory_space<vmem>>) attributes {dimension_semantics = [#tpu.dimension_semantics<parallel>], iteration_bounds = array<i64: 1>, scalar_prefetch = 0 : i64, scratch_operands = 0 : i64, tpu.core_type = #tpu.core_type<tc>, window_params = [{transform_indices = @transform_0, window_bounds = array<i64: 16, 32>}, {pipeline_mode = #tpu.pipeline_mode<synchronous>, transform_indices = @transform_1, window_bounds = array<i64: 32, 128>}, {pipeline_mode = #tpu.pipeline_mode<synchronous>, transform_indices = @transform_2, window_bounds = array<i64: 1, 128>}, {pipeline_mode = #tpu.pipeline_mode<synchronous>, transform_indices = @transform_3, window_bounds = array<i64: 128, 128>}, {pipeline_mode = #tpu.pipeline_mode<synchronous>, transform_indices = @transform_4, window_bounds = array<i64: 1, 128>}, {transform_indices = @transform_5, window_bounds = array<i64: 16, 128>}]} {
    %c0 = arith.constant 0 : index
    %c0_0 = arith.constant 0 : index
    %0 = vector.load %arg1[%c0, %c0_0] : memref<16x32xbf16, #tpu.memory_space<vmem>>, vector<16x32xbf16>
    %c0_1 = arith.constant 0 : index
    %c0_2 = arith.constant 0 : index
    %1 = vector.load %arg2[%c0_1, %c0_2] : memref<32x128xbf16, #tpu.memory_space<vmem>>, vector<32x128xbf16>
    %cst = arith.constant dense<0.000000e+00> : vector<16x128xf32>
    %2 = tpu.matmul %0, %1, %cst {dimension_numbers = #tpu.dot_dimension_numbers<[1], [0], [0], [1], [0, 0, 1, 1], [], []>} : vector<16x32xbf16>, vector<32x128xbf16>, vector<16x128xf32> -> vector<16x128xf32>
    %c0_3 = arith.constant 0 : index
    %c0_4 = arith.constant 0 : index
    %3 = vector.load %arg3[%c0_3, %c0_4] : memref<1x128xf32, #tpu.memory_space<vmem>>, vector<1x128xf32>
    %4 = vector.broadcast %3 : vector<1x128xf32> to vector<16x128xf32>
    %5 = arith.addf %2, %4 : vector<16x128xf32>
    %cst_5 = arith.constant 0.000000e+00 : f32
    %6 = vector.broadcast %cst_5 : f32 to vector<16x128xf32>
    %7 = arith.maximumf %5, %6 : vector<16x128xf32>
    %8 = arith.truncf %7 : vector<16x128xf32> to vector<16x128xbf16>
    %c0_6 = arith.constant 0 : index
    %c0_7 = arith.constant 0 : index
    %9 = vector.load %arg4[%c0_6, %c0_7] : memref<128x128xbf16, #tpu.memory_space<vmem>>, vector<128x128xbf16>
    %cst_8 = arith.constant dense<0.000000e+00> : vector<16x128xf32>
    %10 = tpu.matmul %8, %9, %cst_8 {dimension_numbers = #tpu.dot_dimension_numbers<[1], [0], [0], [1], [0, 0, 1, 1], [], []>} : vector<16x128xbf16>, vector<128x128xbf16>, vector<16x128xf32> -> vector<16x128xf32>
    %c0_9 = arith.constant 0 : index
    %c0_10 = arith.constant 0 : index
    %11 = vector.load %arg5[%c0_9, %c0_10] : memref<1x128xf32, #tpu.memory_space<vmem>>, vector<1x128xf32>
    %12 = vector.broadcast %11 : vector<1x128xf32> to vector<16x128xf32>
    %13 = arith.addf %10, %12 : vector<16x128xf32>
    %c1_i32 = arith.constant 1 : i32
    %14 = tpu.dynamic_rotate %13 by %c1_i32 dim 1 : vector<16x128xf32>, i32 -> vector<16x128xf32>
    %c2_i32 = arith.constant 2 : i32
    %15 = tpu.dynamic_rotate %13 by %c2_i32 dim 1 : vector<16x128xf32>, i32 -> vector<16x128xf32>
    %c3_i32 = arith.constant 3 : i32
    %16 = tpu.dynamic_rotate %13 by %c3_i32 dim 1 : vector<16x128xf32>, i32 -> vector<16x128xf32>
    %17 = arith.addf %13, %14 : vector<16x128xf32>
    %18 = arith.addf %15, %16 : vector<16x128xf32>
    %19 = arith.addf %17, %18 : vector<16x128xf32>
    %20 = arith.minimumf %13, %14 : vector<16x128xf32>
    %21 = arith.minimumf %15, %16 : vector<16x128xf32>
    %22 = arith.minimumf %20, %21 : vector<16x128xf32>
    %23 = arith.maximumf %13, %14 : vector<16x128xf32>
    %24 = arith.maximumf %15, %16 : vector<16x128xf32>
    %25 = arith.maximumf %23, %24 : vector<16x128xf32>
    %26 = arith.subf %19, %22 : vector<16x128xf32>
    %27 = arith.subf %26, %25 : vector<16x128xf32>
    %cst_11 = arith.constant 5.000000e-01 : f32
    %28 = vector.broadcast %cst_11 : f32 to vector<16x128xf32>
    %29 = arith.mulf %27, %28 : vector<16x128xf32>
    %c0_12 = arith.constant 0 : index
    %c0_13 = arith.constant 0 : index
    %30 = vector.load %arg6[%c0_12, %c0_13] : memref<16x128xf32, #tpu.memory_space<vmem>>, vector<16x128xf32>
    tpu.vector_store %arg6[%c0_12, %c0_13], %29 {strides = array<i32>} : memref<16x128xf32, #tpu.memory_space<vmem>>, vector<16x128xf32>,
    return
  }
  func.func @transform_0(%arg0: i32) -> (i32, i32) {
    %c0_i32 = arith.constant 0 : i32
    %c0_i32_0 = arith.constant 0 : i32
    return %arg0, %c0_i32 : i32, i32
  }
  func.func @transform_1(%arg0: i32) -> (i32, i32) {
    %c0_i32 = arith.constant 0 : i32
    %c0_i32_0 = arith.constant 0 : i32
    %c0_i32_1 = arith.constant 0 : i32
    return %c0_i32, %c0_i32_0 : i32, i32
  }
  func.func @transform_2(%arg0: i32) -> (i32, i32) {
    %c0_i32 = arith.constant 0 : i32
    %c0_i32_0 = arith.constant 0 : i32
    %c0_i32_1 = arith.constant 0 : i32
    return %c0_i32, %c0_i32_0 : i32, i32
  }
  func.func @transform_3(%arg0: i32) -> (i32, i32) {
    %c0_i32 = arith.constant 0 : i32
    %c0_i32_0 = arith.constant 0 : i32
    %c0_i32_1 = arith.constant 0 : i32
    return %c0_i32, %c0_i32_0 : i32, i32
  }
  func.func @transform_4(%arg0: i32) -> (i32, i32) {
    %c0_i32 = arith.constant 0 : i32
    %c0_i32_0 = arith.constant 0 : i32
    %c0_i32_1 = arith.constant 0 : i32
    return %c0_i32, %c0_i32_0 : i32, i32
  }
  func.func @transform_5(%arg0: i32) -> (i32, i32) {
    %c0_i32 = arith.constant 0 : i32
    %c0_i32_0 = arith.constant 0 : i32
    return %arg0, %c0_i32 : i32, i32
  }
}

</mosaic_0001>

<bundles_post_ra>
// kernel: forward.1
= control target key start
LH: loop header
LB: loop body
LE: loop exit
PB: predicated region body
PF: predicated region fallthrough
CT: control target
= control target key end

     0   :  { %10 = vsyncpa [#allocation3], 0  ;;  %s363_s18 = smov [#allocation2]   ;;  %s425_s0 = inlined_call_operand.vmem [shape: bf16[16,32], index: 0, kind: input, shape index: {}]   ;;  %s426_s1 = inlined_call_operand.vmem [shape: bf16[32,128], index: 1, kind: input, shape index: {}]   ;;  %s427_s2 = inlined_call_operand.vmem [shape: f32[1,128], index: 2, kind: input, shape index: {}]   ;;  %s428_s3 = inlined_call_operand.hbm [shape: bf16[128,128], index: 3, kind: input, shape index: {}]   ;;  %s429_s4 = inlined_call_operand.vmem [shape: f32[1,128], index: 4, kind: input, shape index: {}]   ;;  %s430_s5 = inlined_call_operand.vmem [shape: f32[16,128], index: 5, kind: output, shape index: {}]  }
   0x1   :  { %s22_s19 = sshll.u32 %s363_s18, 4  ;;  %s23_s19 = int_to_ptr.vmem [resolvable:$true] %s22_s19 }
   0x2   :  { %s349_s20 = scalar_lea.vmem %s23_s19, 1024  ;;  %p354_p1 = scmp.lt.s32.totalorder %s23_s19, %s23_s19 }
   0x3   :  { %p350_p0 = scmp.ne.s32.totalorder %s23_s19, %s349_s20  ;;  %p355_p2 = scmp.lt.s32.totalorder %s349_s20, %s349_s20 }
   0x5   :  { %p356_p3 = por %p355_p2, %p354_p1 }
   0x7   :  { %p357_p4 = pnand %p356_p3, %p350_p0 }
   0x9   :  { %360 = shalt.err (!%p357_p4)
}
   0xa   :  { %s364_s21 = smov 64   ;;  %s365_s22 = smov 4  }
   0xb   :  { %28 = dma.hbm_to_vmem [thread:$0]  %s428_s3, 1024, %s23_s19, [#allocation3], %s364_s21, %s364_s21, %s365_s22  }
   0xc   :  { %361 = dma.done.wait [#allocation3], 1024  }
   0xd   :  { %362 = vsyncadd [#allocation3], 4294966272  ;;  %v366_v0 = vmov 0.0   ;;  %vm367_vm0 = vmmov 0   ;;  %v330_v1 = vld [vmem:[%s426_s1 + $0x8] sm:$0xff]   ;;  %v331_v2 = vld [vmem:[%s426_s1] sm:$0xff]  }
   0xe   :  { %294 = vmatprep.subr.bf16.mxu0 %v366_v0  ;;  %298 = vmatprep.mubr.msk.bf16.mxu0 %vm367_vm0, %v366_v0  ;;  %v333_v3 = vld [vmem:[#allocation2 + $0x38] sm:$0xff]   ;;  %v332_v4 = vld [vmem:[%s425_s0] sm:$0xff]   ;;  %v334_v5 = vld [vmem:[#allocation2 + $0x30] sm:$0xff]   ;;  %vm65_vm1 = vcmask 261120   ;;  %s368_s7 = smov 2   ;;  %s370_s8 = smov 3  }
   0xf   :  { %302 = vmatprep.subr.bf16.mxu1 %v366_v0  ;;  %318 = vmatprep.mubr.msk.bf16.mxu1 %vm367_vm0, %v366_v0  ;;  %v335_v6 = vld [vmem:[#allocation2 + $0x28] sm:$0xff]   ;;  %v336_v7 = vld [vmem:[#allocation2 + $0x20] sm:$0xff]   ;;  %v337_v8 = vld [vmem:[#allocation2 + $0x18] sm:$0xff]  }
  0x10   :  { %295 = vmatpush3.bf16.msra.mxu0 %v330_v1  ;;  %303 = vmatpush3.bf16.msra.mxu1 %v333_v3  ;;  %v338_v9 = vld [vmem:[#allocation2 + $0x10] sm:$0xff]   ;;  %v339_v10 = vld [vmem:[#allocation2 + $0x8] sm:$0xff]   ;;  %v340_v11 = vld [vmem:[#allocation2] sm:$0xff]  }
  0x11   :  { %296 = vmatprep.subr.bf16.mxu0 %v366_v0  ;;  %304 = vmatprep.subr.bf16.mxu1 %v366_v0  ;;  %v268_v12 = vld [vmem:[%s427_s2] ss:$0 sm:$0xff]  ;;  %s369_s2 = smov 1  }
  0x12   :  { %v273_v22 = vld [vmem:[%s429_s4] ss:$0 sm:$0xff] }
  0x14   :  { %297 = vmatpush3.bf16.msra.mxu0 %v331_v2  ;;  %305 = vmatpush3.bf16.msra.mxu1 %v334_v5 }
  0x15   :  { %306 = vmatprep.subr.bf16.mxu1 %v366_v0 }
  0x17   :  { %299 = vmatmul.mubr.msk.bf16.vlgmr.msra.gmra.mxu0 %vm65_vm1, %v332_v4 }
  0x18   :  { %307 = vmatpush3.bf16.msra.mxu1 %v335_v6 }
  0x19   :  { %308 = vmatprep.subr.bf16.mxu1 %v366_v0 }
  0x1c   :  { %309 = vmatpush3.bf16.msra.mxu1 %v336_v7 }
  0x1d   :  { %310 = vmatprep.subr.bf16.mxu1 %v366_v0 }
  0x20   :  { %311 = vmatpush3.bf16.msra.mxu1 %v337_v8 }
  0x21   :  { %312 = vmatprep.subr.bf16.mxu1 %v366_v0 }
  0x24   :  { %313 = vmatpush3.bf16.msra.mxu1 %v338_v9 }
  0x25   :  { %314 = vmatprep.subr.bf16.mxu1 %v366_v0 }
  0x28   :  { %315 = vmatpush3.bf16.msra.mxu1 %v339_v10 }
  0x29   :  { %316 = vmatprep.subr.bf16.mxu1 %v366_v0 }
  0x2c   :  { %317 = vmatpush3.bf16.msra.mxu1 %v340_v11 }
  0xd7   :  { %v103_v13 = vpop.f32.mrf.mxu0 }
  0xd8   :  { %v104_v15 = vadd.f32 %v268_v12, %v103_v13 }
  0xd9   :  { %v300_v14 = vpop.f32.mrf.mxu0 }
  0xda   :  { %v110_v19 = vmax.f32 %v104_v15, 0.0 }
  0xdb   :  { %v106_v16 = vpop.f32.mrf.mxu0 }
  0xdc   :  { %v107_v17 = vadd.f32 %v268_v12, %v106_v16 }
  0xdd   :  { %v301_v18 = vpop.f32.mrf.mxu0 }
  0xde   :  { %v111_v20 = vmax.f32 %v107_v17, 0.0 }
  0xe0   :  { %v112_v21 = vpack.c.bf16 %v111_v20, %v110_v19 }
  0xe2   :  { %319 = vmatmul.mubr.bf16.vlgmr.msra.gmra.mxu1 %v112_v21 }
 0x1a2   :  { %v218_v23 = vpop.f32.mrf.mxu1 }
 0x1a3   :  { %v219_v24 = vadd.f32 %v273_v22, %v218_v23 }
 0x1a4   :  { %v320_v25 = vpop.f32.mrf.mxu1 }
 0x1a5   :  { %229 = vrot.lane.b32.xlu1 %v219_v24, %s368_s7  ;;  %225 = vrot.lane.b32.xlu0 %v219_v24, %s369_s2 }
 0x1a6   :  { %v221_v26 = vpop.f32.mrf.mxu1 }
 0x1a7   :  { %v222_v27 = vadd.f32 %v273_v22, %v221_v26 }
 0x1a8   :  { %v321_v28 = vpop.f32.mrf.mxu1 }
 0x1a9   :  { %231 = vrot.lane.b32.xlu1 %v222_v27, %s368_s7  ;;  %227 = vrot.lane.b32.xlu0 %v222_v27, %s369_s2 }
 0x1ad   :  { %235 = vrot.lane.b32.xlu1 %v222_v27, %s370_s8  ;;  %233 = vrot.lane.b32.xlu0 %v219_v24, %s370_s8 }
 0x217   :  { %v230_v29 = vpop.permute.xlu1 %229  ;;  %v226_v30 = vpop.permute.xlu0 %225 }
 0x218   :  { %v237_v33 = vadd.f32 %v226_v30, %v219_v24  ;;  %v243_v42 = vmin.f32 %v219_v24, %v226_v30  ;;  %v249_v49 = vmax.f32 %v219_v24, %v226_v30 }
 0x21b   :  { %v232_v31 = vpop.permute.xlu1 %231  ;;  %v228_v32 = vpop.permute.xlu0 %227 }
 0x21c   :  { %v238_v34 = vadd.f32 %v228_v32, %v222_v27  ;;  %v244_v35 = vmin.f32 %v222_v27, %v228_v32  ;;  %v250_v45 = vmax.f32 %v222_v27, %v228_v32 }
 0x21f   :  { %v236_v36 = vpop.permute.xlu1 %235  ;;  %v234_v37 = vpop.permute.xlu0 %233 }
 0x220   :  { %v240_v38 = vadd.f32 %v236_v36, %v232_v31  ;;  %v246_v39 = vmin.f32 %v232_v31, %v236_v36  ;;  %v252_v40 = vmax.f32 %v232_v31, %v236_v36  ;;  %v239_v41 = vadd.f32 %v234_v37, %v230_v29 }
 0x221   :  { %v245_v43 = vmin.f32 %v230_v29, %v234_v37  ;;  %v251_v44 = vmax.f32 %v230_v29, %v234_v37 }
 0x222   :  { %v242_v46 = vadd.f32 %v240_v38, %v238_v34  ;;  %v248_v47 = vmin.f32 %v244_v35, %v246_v39  ;;  %v241_v48 = vadd.f32 %v239_v41, %v237_v33  ;;  %v254_v51 = vmax.f32 %v250_v45, %v252_v40 }
 0x223   :  { %v247_v50 = vmin.f32 %v243_v42, %v245_v43  ;;  %v253_v53 = vmax.f32 %v249_v49, %v251_v44 }
 0x224   :  { %v256_v52 = vsub.f32 %v242_v46, %v248_v47 }
 0x225   :  { %v255_v54 = vsub.f32 %v241_v48, %v247_v50 }
 0x226   :  { %v258_v55 = vsub.f32 %v256_v52, %v254_v51 }
 0x227   :  { %v257_v56 = vsub.f32 %v255_v54, %v253_v53 }
 0x228   :  { %v260_v57 = vmul.f32 0.5, %v258_v55 }
 0x229   :  { %v259_v58 = vmul.f32 0.5, %v257_v56 }
 0x22a   :  { %262 = vst [vmem:[%s430_s5 + $0x8] sm:$0xff] %v260_v57 }
 0x22b   :  { %261 = vst [vmem:[%s430_s5] sm:$0xff] %v259_v58 }
 0x22c   :  { %267 = vsyncpa [#allocation3], 1 }

</bundles_post_ra>
